<compile_context>
chip_gen: v7x
topology: tpu7x:2x2x1
jax: 0.10.0
libtpu: 0.0.40
codegen_flags: <defaults>
</compile_context>

<pallas_src>
import functools

import numpy as np

import jax
import jax.numpy as jnp
from jax import lax
from jax.experimental import pallas as pl
from jax.experimental.pallas import tpu as pltpu

_BN_EPS = 1e-5


# ----------------------------------------------------------------------------
# One-time probe of the pltpu.roll shift convention (np.roll-compatible or the
# opposite direction).  Makes the tap-shift direction robust across versions.
# ----------------------------------------------------------------------------
@functools.lru_cache(maxsize=None)
def _roll_matches_numpy() -> bool:
    def probe(x_ref, o_ref):
        o_ref[...] = pltpu.roll(x_ref[...], 1, 1)

    x = jnp.arange(8 * 128, dtype=jnp.float32).reshape(8, 128)
    y = pl.pallas_call(probe, out_shape=jax.ShapeDtypeStruct((8, 128), jnp.float32))(x)
    # np.roll semantics: row [0..127] -> [127, 0, 1, ...]
    return bool(y[0, 0] == 127.0)


# ----------------------------------------------------------------------------
# Host-side constants: tap-validity masks and stride-selection matrix.
# ----------------------------------------------------------------------------
def _tap_masks(H, W, dilation):
    """(9, H*W) float32 validity masks for the 3x3 'same' depthwise taps."""
    r = np.arange(H).reshape(H, 1)
    c = np.arange(W).reshape(1, W)
    rows = []
    for ki in range(3):
        for kj in range(3):
            oi, oj = (ki - 1) * dilation, (kj - 1) * dilation
            m = (r + oi >= 0) & (r + oi < H) & (c + oj >= 0) & (c + oj < W)
            rows.append(m.astype(np.float32).reshape(H * W))
    return jnp.asarray(np.stack(rows))


def _stride_selector(H, W, s):
    """(H*W, Ho*Wo) 0/1 matrix; right-multiplying a (C, H*W) map subsamples it by s."""
    Ho, Wo = -(-H // s), -(-W // s)
    src = (np.arange(Ho)[:, None] * s) * W + np.arange(Wo)[None, :] * s
    sel = np.zeros((H * W, Ho * Wo), np.float32)
    sel[src.reshape(-1), np.arange(Ho * Wo)] = 1.0
    return jnp.asarray(sel)


# ----------------------------------------------------------------------------
# Fused Block kernel (one batch element per grid step).
# ----------------------------------------------------------------------------
def _make_block_kernel(step_meta, *, W, HW, n_masks, block_stride, has_skip_conv,
                       use_selector, roll_like_numpy):
    def kernel(*refs):
        pos = 0
        x_ref = refs[pos]; pos += 1
        step_refs = []
        for meta in step_meta:
            if meta["bn"]:
                step_refs.append(tuple(refs[pos:pos + 3])); pos += 3
            else:
                step_refs.append(tuple(refs[pos:pos + 2]) + (None,)); pos += 2
        mask_refs = refs[pos:pos + n_masks]; pos += n_masks
        sel_ref = None
        if use_selector:
            sel_ref = refs[pos]; pos += 1
        if has_skip_conv:
            skw_ref, skb_ref = refs[pos], refs[pos + 1]; pos += 2
        o_ref = refs[pos]

        # Selector is reused by the stride step and the skip branch: load once.
        sel = sel_ref[...] if use_selector else None

        x_in = x_ref[0]                                # (Cin, HW) f32, lane-dense
        x = x_in
        for (dw_ref, pw_ref, b_ref), meta in zip(step_refs, step_meta):
            if meta["relu"]:
                x = jnp.maximum(x, 0.0)

            # ---- depthwise 3x3, 'same' zero padding via masks, dilation d ----
            d = meta["dilation"]
            dw = dw_ref[...]                           # (cin, 9) per-channel taps
            m_ref = mask_refs[meta["mask_idx"]]        # (9, HW)  0/1 border validity
            acc = x * dw[:, 4:5]                       # centre tap (offset 0), always valid
            for ki in range(3):
                for kj in range(3):
                    if ki == 1 and kj == 1:
                        continue
                    tap = ki * 3 + kj
                    off = ((ki - 1) * W + (kj - 1)) * d          # flat spatial offset
                    shift = (-off) % HW if roll_like_numpy else off % HW
                    shifted = pltpu.roll(x, shift, 1)            # XLU lane rotation
                    msk = m_ref[tap:tap + 1, :]                  # (1, HW) row load
                    acc = acc + (shifted * msk) * dw[:, tap:tap + 1]

            # ---- stride: subsample before the 1x1 (they commute) ----
            if meta["stride"] != 1:
                acc = jnp.dot(acc, sel, preferred_element_type=jnp.float32)

            # ---- pointwise 1x1 on the MXU (BN scale folded into weights) ----
            y = jnp.dot(pw_ref[...], acc, preferred_element_type=jnp.float32)
            if meta["bn"]:
                y = y + b_ref[...]                     # (cout, 1) broadcast bias
            x = y

        # ---- skip branch + residual add ----
        if has_skip_conv:
            xs = x_in
            if block_stride != 1:
                xs = jnp.dot(xs, sel, preferred_element_type=jnp.float32)
            sk = jnp.dot(skw_ref[...], xs, preferred_element_type=jnp.float32) + skb_ref[...]
        else:
            sk = x_in                                   # identity skip (planes==inplanes, stride==1)
        o_ref[0] = (x + sk).astype(o_ref.dtype)

    return kernel


# ----------------------------------------------------------------------------
# Block (mirrors the PyTorch constructor / forward)
# ----------------------------------------------------------------------------
class BlockPallas:
    def __init__(self, key, inplanes, planes, reps, stride=1, dilation=1,
                 start_with_relu=True, grow_first=True, dtype=jnp.float32):
        self.inplanes, self.planes, self.stride = inplanes, planes, stride
        keys = iter(jax.random.split(key, 64))

        def conv_w(shape, fan_in):
            return (jax.random.normal(next(keys), shape, dtype)
                    / jnp.sqrt(jnp.asarray(fan_in, dtype))).astype(dtype)

        def bn_params(c):
            gamma = 1.0 + 0.1 * jax.random.normal(next(keys), (c,), dtype)
            beta = 0.1 * jax.random.normal(next(keys), (c,), dtype)
            mean = 0.1 * jax.random.normal(next(keys), (c,), dtype)
            var = jnp.abs(jax.random.normal(next(keys), (c,), dtype)) + 0.5
            scale = gamma / jnp.sqrt(var + _BN_EPS)
            bias = beta - mean * scale
            return scale, bias

        # Build the "rep" sequence exactly as the PyTorch constructor does.
        steps = []
        filters = inplanes
        if grow_first:
            steps.append(dict(relu=True, cin=inplanes, cout=planes,
                              dilation=dilation, stride=1, bn=True))
            filters = planes
        for _ in range(reps - 1):
            steps.append(dict(relu=True, cin=filters, cout=filters,
                              dilation=dilation, stride=1, bn=True))
        if not grow_first:
            steps.append(dict(relu=True, cin=inplanes, cout=planes,
                              dilation=dilation, stride=1, bn=True))
        if not start_with_relu:
            steps[0]["relu"] = False          # rep = rep[1:] drops the leading ReLU
        if stride != 1:
            steps.append(dict(relu=False, cin=planes, cout=planes,
                              dilation=1, stride=stride, bn=False))

        for st in steps:
            cin, cout = st["cin"], st["cout"]
            st["dw"] = conv_w((cin, 9), 9.0)             # depthwise 3x3 (groups=cin)
            st["pw"] = conv_w((cout, cin), float(cin))   # pointwise 1x1
            if st["bn"]:
                st["scale"], st["bias"] = bn_params(cout)
        self.steps = steps

        self.has_skip_conv = (planes != inplanes) or (stride != 1)
        if self.has_skip_conv:
            self.skip_w = conv_w((planes, inplanes), float(inplanes))
            self.skip_scale, self.skip_bias = bn_params(planes)

    def __call__(self, inp):                  # inp: (N, C, H, W) float32
        N, C, H, W = inp.shape
        HW = H * W
        s = self.stride
        Ho, Wo = -(-H // s), -(-W // s)
        HWo = Ho * Wo
        use_selector = (s != 1)

        # Distinct dilations -> one tap-mask DMA each (dedup).
        dilations = []
        for st in self.steps:
            if st["dilation"] not in dilations:
                dilations.append(st["dilation"])
        mask_idx = {d: i for i, d in enumerate(dilations)}

        inputs = [inp.reshape(N, C, HW)]      # lane-dense (C, H*W) layout (free reshape)
        in_specs = [pl.BlockSpec((1, C, HW), lambda n: (n, 0, 0))]
        step_meta = []
        for st in self.steps:
            cin, cout = st["cin"], st["cout"]
            if st["bn"]:                      # fold BN scale into the 1x1 weights
                pw = st["scale"][:, None] * st["pw"]
            else:
                pw = st["pw"]
            inputs += [st["dw"], pw]
            in_specs += [pl.BlockSpec((cin, 9), lambda n: (0, 0)),
                         pl.BlockSpec((cout, cin), lambda n: (0, 0))]
            if st["bn"]:
                inputs.append(st["bias"][:, None])
                in_specs.append(pl.BlockSpec((cout, 1), lambda n: (0, 0)))
            step_meta.append(dict(relu=st["relu"], dilation=st["dilation"],
                                  stride=st["stride"], bn=st["bn"],
                                  mask_idx=mask_idx[st["dilation"]]))
        for d in dilations:
            inputs.append(_tap_masks(H, W, d))
            in_specs.append(pl.BlockSpec((9, HW), lambda n: (0, 0)))
        if use_selector:
            inputs.append(_stride_selector(H, W, s))
            in_specs.append(pl.BlockSpec((HW, HWo), lambda n: (0, 0)))
        if self.has_skip_conv:
            inputs += [self.skip_scale[:, None] * self.skip_w, self.skip_bias[:, None]]
            in_specs += [pl.BlockSpec((self.planes, self.inplanes), lambda n: (0, 0)),
                         pl.BlockSpec((self.planes, 1), lambda n: (0, 0))]

        kernel = _make_block_kernel(step_meta, W=W, HW=HW, n_masks=len(dilations),
                                    block_stride=s,
                                    has_skip_conv=self.has_skip_conv,
                                    use_selector=use_selector,
                                    roll_like_numpy=_roll_matches_numpy())

        out = pl.pallas_call(
            kernel,
            out_shape=jax.ShapeDtypeStruct((N, self.planes, HWo), inp.dtype),
            grid=(N,),
            in_specs=in_specs,
            out_specs=pl.BlockSpec((1, self.planes, HWo), lambda n: (n, 0, 0)),
            compiler_params=pltpu.CompilerParams(dimension_semantics=("parallel",)),
        )(*inputs)
        return out.reshape(N, self.planes, Ho, Wo)


# ----------------------------------------------------------------------------
# Pure-JAX reference (independent, uses lax.conv) for verification
# ----------------------------------------------------------------------------
def _ref_block(block, inp):
    dn = ('NCHW', 'OIHW', 'NCHW')
    x = inp.astype(jnp.float32)
    for st in block.steps:
        if st["relu"]:
            x = jnp.maximum(x, 0.0)
        pad = st["dilation"]
        xp = jnp.pad(x, ((0, 0), (0, 0), (pad, pad), (pad, pad)))
        cin, cout = st["cin"], st["cout"]
        s, d = st["stride"], st["dilation"]
        x = lax.conv_general_dilated(xp, st["dw"].reshape(cin, 1, 3, 3),
                                     (s, s), 'VALID', rhs_dilation=(d, d),
                                     dimension_numbers=dn, feature_group_count=cin)
        x = lax.conv_general_dilated(x, st["pw"].reshape(cout, cin, 1, 1),
                                     (1, 1), 'VALID', dimension_numbers=dn)
        if st["bn"]:
            x = x * st["scale"][None, :, None, None] + st["bias"][None, :, None, None]
    s = block.stride
    if block.has_skip_conv:
        w = block.skip_w.reshape(block.planes, block.inplanes, 1, 1)
        sk = lax.conv_general_dilated(inp, w, (s, s), 'VALID', dimension_numbers=dn)
        sk = sk * block.skip_scale[None, :, None, None] + block.skip_bias[None, :, None, None]
    else:
        sk = inp
    return x + sk


def _check(name, block, x, expect_shape):
    out = jax.block_until_ready(block(x))
    ref = jax.block_until_ready(_ref_block(block, x))
    assert out.shape == expect_shape, (name, out.shape)
    assert ref.shape == expect_shape, (name, ref.shape)
    err = float(jnp.max(jnp.abs(out - ref)))
    # MXU matmuls in-kernel vs XLA convs in the reference may use different f32
    # matmul pass counts; tolerance is loose enough for that, tight enough to
    # catch any structural/indexing bug (those produce O(1) errors).
    if not bool(jnp.allclose(out, ref, rtol=2e-2, atol=2e-2)):
        raise AssertionError(f"{name}: mismatch vs reference, max abs err = {err:.3e}")
    return out


if __name__ == "__main__":
    key = jax.random.PRNGKey(0)
    k1, k2, kx1, kx2 = jax.random.split(key, 4)

    # Config 1: strided block with 1x1+BN skip conv (entry-flow style).
    blk1 = BlockPallas(k1, inplanes=4, planes=8, reps=2, stride=2,
                       dilation=1, start_with_relu=True, grow_first=True)
    x1 = jax.random.normal(kx1, (2, 4, 16, 16), jnp.float32)
    _check("strided_skipconv", blk1, x1, (2, 8, 8, 8))

    # Config 2: identity-skip block with dilation=2 (middle-flow style).
    blk2 = BlockPallas(k2, inplanes=8, planes=8, reps=2, stride=1,
                       dilation=2, start_with_relu=False, grow_first=False)
    x2 = jax.random.normal(kx2, (2, 8, 16, 16), jnp.float32)
    _check("identity_skip_dilated", blk2, x2, (2, 8, 16, 16))

    print("KERNEL_OK")
</pallas_src>

<mosaic_0001>
module attributes {stable_mosaic.version = 11 : i64} {
  func.func @probe(%arg0: memref<8x128xf32, #tpu.memory_space<vmem>>, %arg1: memref<8x128xf32, #tpu.memory_space<vmem>>) attributes {dimension_semantics = [], scalar_prefetch = 0 : i64, scratch_operands = 0 : i64, tpu.core_type = #tpu.core_type<tc>} {
    %c0 = arith.constant 0 : index
    %c0_0 = arith.constant 0 : index
    %0 = vector.load %arg0[%c0, %c0_0] : memref<8x128xf32, #tpu.memory_space<vmem>>, vector<8x128xf32>
    %c1_i32 = arith.constant 1 : i32
    %1 = tpu.dynamic_rotate %0 by %c1_i32 dim 1 : vector<8x128xf32>, i32 -> vector<8x128xf32>
    %c0_1 = arith.constant 0 : index
    %c0_2 = arith.constant 0 : index
    %2 = vector.load %arg1[%c0_1, %c0_2] : memref<8x128xf32, #tpu.memory_space<vmem>>, vector<8x128xf32>
    tpu.vector_store %arg1[%c0_1, %c0_2], %1 {strides = array<i32>} : memref<8x128xf32, #tpu.memory_space<vmem>>, vector<8x128xf32>,
    return
  }
}

</mosaic_0001>

<bundles_post_ra>
// kernel: tpu_custom_call.1
= control target key start
LH: loop header
LB: loop body
LE: loop exit
PB: predicated region body
PF: predicated region fallthrough
CT: control target
= control target key end

     0   :  { %6 = vsyncpa [#allocation3], 0  ;;  %s128_s0 = inlined_call_operand.hbm [shape: f32[8,128], index: 0, kind: input, shape index: {}]   ;;  %s129_s1 = inlined_call_operand.hbm [shape: f32[8,128], index: 1, kind: output, shape index: {}]  }
   0x1   :  { %7 = vsyncpa [#allocation4], 0  ;;  %s91_s6 = smov [#allocation2]   ;;  %s43_s10 = scalar_lea.hbm %s128_s0, 128 }
   0x2   :  { %s14_s7 = sshll.u32 %s91_s6, 4  ;;  %p44_p0 = scmp.ne.s32.totalorder %s128_s0, %s43_s10  ;;  %s15_s7 = int_to_ptr.vmem [resolvable:$true] %s14_s7 }
   0x3   :  { %p47_p1 = scmp.lt.u32.totalorder %s43_s10, %s128_s0 }
   0x5   :  { %p49_p2 = pnand %p47_p1, %p44_p0 }
   0x7   :  { %52 = shalt.err (!%p49_p2)
}
   0x8   :  { %s53_s15 = scalar_lea.vmem %s15_s7, 128  ;;  %p58_p4 = scmp.lt.s32.totalorder %s15_s7, %s15_s7 }
   0x9   :  { %p54_p3 = scmp.ne.s32.totalorder %s15_s7, %s53_s15  ;;  %p59_p5 = scmp.lt.s32.totalorder %s53_s15, %s53_s15 }
   0xb   :  { %p60_p6 = por %p59_p5, %p58_p4 }
   0xd   :  { %p61_p7 = pnand %p60_p6, %p54_p3 }
   0xf   :  { %64 = shalt.err (!%p61_p7)
}
  0x10   :  { %17 = dma.hbm_to_vmem [thread:$0]  %s128_s0, 128, %s15_s7, [#allocation3]  }
  0x11   :  { %87 = dma.done.wait [#allocation3], 128  }
  0x12   :  { %88 = vsyncadd [#allocation3], 4294967168  ;;  %v21_v0 = vld [vmem:[#allocation2] sm:$0xff]  ;;  %s92_s18 = smov 1   ;;  %s93_s19 = smov [#allocation5]  }
  0x13   :  { %22 = vrot.lane.b32.xlu0 %v21_v0, %s92_s18  ;;  %s31_s20 = sshll.u32 %s93_s19, 4  ;;  %s32_s20 = int_to_ptr.vmem [resolvable:$true] %s31_s20 }
  0x14   :  { %s65_s21 = scalar_lea.vmem %s32_s20, 128  ;;  %p70_p9 = scmp.lt.s32.totalorder %s32_s20, %s32_s20 }
  0x15   :  { %p66_p8 = scmp.ne.s32.totalorder %s32_s20, %s65_s21  ;;  %p71_p10 = scmp.lt.s32.totalorder %s65_s21, %s65_s21 }
  0x17   :  { %p72_p11 = por %p71_p10, %p70_p9 }
  0x19   :  { %p73_p12 = pnand %p72_p11, %p66_p8 }
  0x85   :  { %v23_v1 = vpop.permute.xlu0 %22 }
  0x86   :  { %24 = vst [vmem:[#allocation5] sm:$0xff] %v23_v1 }
  0x87   :  { %76 = shalt.err (!%p73_p12)
}
  0x88   :  { %s77_s0 = scalar_lea.hbm %s129_s1, 128 }
  0x89   :  { %p78_p13 = scmp.ne.s32.totalorder %s129_s1, %s77_s0  ;;  %p81_p0 = scmp.lt.u32.totalorder %s77_s0, %s129_s1 }
  0x8b   :  { %p83_p1 = pnand %p81_p0, %p78_p13 }
  0x8d   :  { %86 = shalt.err (!%p83_p1)
}
  0x8e   :  { %34 = dma.vmem_to_hbm [thread:$0]  %s32_s20, 128, %s129_s1, [#allocation4]  }
  0x8f   :  { %89 = dma.done.wait [#allocation4], 128  }
  0x90   :  { %90 = vsyncadd [#allocation4], 4294967168 }
  0x91   :  { %38 = vsyncpa [#allocation3], 1 }
  0x92   :  { %39 = vsyncpa [#allocation4], 1 }

</bundles_post_ra>
